<compile_context>
chip_gen: v7x
topology: tpu7x:2x2x1
jax: 0.10.0
libtpu: 0.0.40
codegen_flags: <defaults>
</compile_context>

<pallas_src>
import math
from functools import partial

import jax
import jax.numpy as jnp
from jax import lax
from jax.experimental import pallas as pl
from jax.experimental.pallas import tpu as pltpu


def _round_up(x, m):
    return ((x + m - 1) // m) * m


def _pick_tile(dim, default):
    """Block == full dim for small dims (always legal per the (8,128) rule,
    and requires no padding); otherwise use the aligned default tile."""
    return dim if dim <= default else default


# ---------------------------------------------------------------------------
# Kernels
# ---------------------------------------------------------------------------

def _linear_acc_kernel(x_ref, w_ref, b_ref, o_ref, acc_ref, *, precision):
    """One (tm, tn) output tile, accumulating over the K grid axis (axis 2)."""
    k = pl.program_id(2)

    @pl.when(k == 0)
    def _():
        acc_ref[...] = jnp.zeros_like(acc_ref)

    # x_ref: (tm, tk) @ w_ref: (tk, tn).  Weight is pre-laid-out as (K, N), so
    # this is the native MXU contraction (no per-tile transpose), f32 acc.
    acc_ref[...] += jnp.dot(x_ref[...], w_ref[...],
                            preferred_element_type=jnp.float32,
                            precision=precision)

    @pl.when(k == pl.num_programs(2) - 1)
    def _():
        # Epilogue only: broadcasted bias add in f32, single downcast + store.
        o_ref[...] = (acc_ref[...] + b_ref[...].astype(jnp.float32)).astype(o_ref.dtype)


def _linear_direct_kernel(x_ref, w_ref, b_ref, o_ref, *, precision):
    """Fast path when the whole K dim fits in one tile: no scratch
    accumulator round-trip, write the finished tile directly."""
    acc = jnp.dot(x_ref[...], w_ref[...],
                  preferred_element_type=jnp.float32,
                  precision=precision)
    o_ref[...] = (acc + b_ref[...].astype(jnp.float32)).astype(o_ref.dtype)


# ---------------------------------------------------------------------------
# Module-like wrapper (mirrors torch.nn.Linear)
# ---------------------------------------------------------------------------

class PallasLinear:
    """y = x @ weight.T + bias, matching torch.nn.Linear semantics.

    weight: (dim_out, dim_in)  -- PyTorch convention; transposed/padded ONCE
                                  here into a (K, N) layout for the kernel.
    bias:   (dim_out,)
    """

    def __init__(self, weight, bias, *, tm=512, tn=512, tk=512,
                 compute_dtype=None):
        weight = jnp.asarray(weight)
        bias = jnp.asarray(bias)
        self.dim_out, self.dim_in = weight.shape
        N, K = self.dim_out, self.dim_in

        self.tm_default = tm
        self.tn = _pick_tile(N, tn)
        self.tk = _pick_tile(K, tk)
        self.Np = _round_up(N, self.tn)
        self.Kp = _round_up(K, self.tk)
        self.compute_dtype = compute_dtype

        # One-time weight layout: (dim_out, dim_in) -> (K, N), padded to tile
        # multiples here (outside the hot path), never per forward call.
        w_kn = weight.T
        if compute_dtype is not None:
            w_kn = w_kn.astype(compute_dtype)
        if (self.Kp, self.Np) != (K, N):
            w_kn = jnp.pad(w_kn, ((0, self.Kp - K), (0, self.Np - N)))
        self.w_kn = w_kn

        b_row = bias.reshape(1, N)
        if self.Np != N:
            b_row = jnp.pad(b_row, ((0, 0), (0, self.Np - N)))
        self.b_row = b_row

    def __call__(self, x):
        x = jnp.asarray(x)
        out_dtype = x.dtype
        lead = x.shape[:-1]
        K, N = self.dim_in, self.dim_out
        Kp, Np = self.Kp, self.Np
        M = math.prod(lead)

        tm = _pick_tile(M, self.tm_default)
        tn, tk = self.tn, self.tk
        Mp = _round_up(M, tm)
        grid_m, grid_n, grid_k = Mp // tm, Np // tn, Kp // tk

        # v7x megacore: for large problems make sure the two parallel grid
        # axes produce >= 2 tiles so both TensorCores get work.
        if grid_m * grid_n < 2 and M * N >= (1 << 18):
            if tn >= 256 and (tn // 2) % 128 == 0 and Np % (tn // 2) == 0:
                tn //= 2
            elif tm >= 16 and (tm // 2) % 8 == 0 and Mp % (tm // 2) == 0:
                tm //= 2
            grid_m, grid_n = Mp // tm, Np // tn

        x2d = x.reshape(M, K)
        if self.compute_dtype is not None and x2d.dtype != self.compute_dtype:
            x2d = x2d.astype(self.compute_dtype)
        if (Mp, Kp) != (M, K):
            # Only the activations may need per-call padding (and only when
            # M/K are not already tile multiples).
            x2d = jnp.pad(x2d, ((0, Mp - M), (0, Kp - K)))

        # Exact f32 matmul when operands are f32 (avoids bf16-pass MXU
        # emulation flakiness); default precision for bf16 operands.
        precision = (lax.Precision.HIGHEST
                     if x2d.dtype == jnp.float32 else lax.Precision.DEFAULT)

        if grid_k == 1:
            kernel = partial(_linear_direct_kernel, precision=precision)
            grid = (grid_m, grid_n)
            in_specs = [
                pl.BlockSpec((tm, tk), lambda i, j: (i, 0)),    # activations
                pl.BlockSpec((tk, tn), lambda i, j: (0, j)),    # weight (K, N)
                pl.BlockSpec((1, tn), lambda i, j: (0, j)),     # bias row
            ]
            out_spec = pl.BlockSpec((tm, tn), lambda i, j: (i, j))
            scratch_shapes = []
            dim_sem = ("parallel", "parallel")
            acc_bytes = 0
        else:
            kernel = partial(_linear_acc_kernel, precision=precision)
            grid = (grid_m, grid_n, grid_k)
            in_specs = [
                pl.BlockSpec((tm, tk), lambda i, j, k: (i, k)),  # activations
                pl.BlockSpec((tk, tn), lambda i, j, k: (k, j)),  # weight (K, N)
                pl.BlockSpec((1, tn), lambda i, j, k: (0, j)),   # bias row
            ]
            out_spec = pl.BlockSpec((tm, tn), lambda i, j, k: (i, j))
            scratch_shapes = [pltpu.VMEM((tm, tn), jnp.float32)]
            dim_sem = ("parallel", "parallel", "arbitrary")
            acc_bytes = tm * tn * 4

        in_bytes = x2d.dtype.itemsize
        w_bytes = self.w_kn.dtype.itemsize
        b_bytes = self.b_row.dtype.itemsize
        out_bytes = jnp.dtype(out_dtype).itemsize

        # Derive the VMEM cap from the actual tile footprint (double-buffered
        # inputs + output + accumulator), capped at 48 MiB so the same config
        # stays safe on v7x's 64 MiB VMEM.
        footprint = (2 * (tm * tk * in_bytes + tk * tn * w_bytes + tn * b_bytes)
                     + 2 * tm * tn * out_bytes + acc_bytes)
        vmem_limit = min(48 * 1024 * 1024, max(32 * 1024 * 1024, 2 * footprint))

        # bytes_accessed reflects the tiled re-read factor: W is re-read once
        # per M tile, x once per N tile.
        cost = pl.CostEstimate(
            flops=2 * Mp * Np * Kp,
            transcendentals=0,
            bytes_accessed=(Mp * Kp * in_bytes * grid_n
                            + Kp * Np * w_bytes * grid_m
                            + Np * b_bytes * grid_m
                            + Mp * Np * out_bytes),
        )

        out = pl.pallas_call(
            kernel,
            out_shape=jax.ShapeDtypeStruct((Mp, Np), out_dtype),
            grid_spec=pltpu.PrefetchScalarGridSpec(
                num_scalar_prefetch=0,
                grid=grid,
                in_specs=in_specs,
                out_specs=out_spec,
                scratch_shapes=scratch_shapes,
            ),
            compiler_params=pltpu.CompilerParams(
                dimension_semantics=dim_sem,
                vmem_limit_bytes=vmem_limit,
            ),
            cost_estimate=cost,
        )(x2d, self.w_kn, self.b_row)

        if (Mp, Np) != (M, N):
            out = out[:M, :N]
        return out.reshape(*lead, N)


def init_linear_params(key, dim_in, dim_out, dtype=jnp.float32):
    """Deterministic init mirroring torch.nn.Linear defaults
    (kaiming-uniform weight, uniform bias with bound 1/sqrt(fan_in))."""
    k_w, k_b = jax.random.split(key)
    bound_w = math.sqrt(1.0 / dim_in) * math.sqrt(3.0)  # kaiming_uniform(a=sqrt(5))
    weight = jax.random.uniform(k_w, (dim_out, dim_in), dtype,
                                minval=-bound_w, maxval=bound_w)
    bound_b = 1.0 / math.sqrt(dim_in)
    bias = jax.random.uniform(k_b, (dim_out,), dtype,
                              minval=-bound_b, maxval=bound_b)
    return weight, bias


if __name__ == "__main__":
    key = jax.random.PRNGKey(0)
    k_x, k_p, k_x2, k_p2 = jax.random.split(key, 4)

    # Small demo shapes implied by the module (seq model, last-dim Linear).
    batch, seq, dim_in, dim_out = 2, 8, 32, 64
    x = jax.random.normal(k_x, (batch, seq, dim_in), jnp.float32)
    weight, bias = init_linear_params(k_p, dim_in, dim_out)

    layer = PallasLinear(weight, bias)            # one-time (K, N) layout
    y = jax.block_until_ready(layer(x))           # small-K direct fast path

    y_ref = x @ weight.T + bias
    assert y.shape == (batch, seq, dim_out)
    assert jnp.allclose(y, y_ref, atol=1e-5, rtol=1e-5)

    # Second check exercising the K-accumulator grid + padding path.
    dim_in2, dim_out2 = 640, 192                  # K > tk -> grid_k = 2
    x2 = jax.random.normal(k_x2, (batch, seq, dim_in2), jnp.float32)
    weight2, bias2 = init_linear_params(k_p2, dim_in2, dim_out2)
    layer2 = PallasLinear(weight2, bias2)
    y2 = jax.block_until_ready(layer2(x2))
    y2_ref = x2 @ weight2.T + bias2
    assert y2.shape == (batch, seq, dim_out2)
    assert jnp.allclose(y2, y2_ref, atol=1e-4, rtol=1e-4)

    print("KERNEL_OK")
</pallas_src>

<mosaic_0001>
module attributes {stable_mosaic.version = 11 : i64} {
  func.func @_linear_direct_kernel(%arg0: i32, %arg1: i32, %arg2: memref<16x32xf32, #tpu.memory_space<vmem>>, %arg3: memref<32x64xf32, #tpu.memory_space<vmem>>, %arg4: memref<1x64xf32, #tpu.memory_space<vmem>>, %arg5: memref<16x64xf32, #tpu.memory_space<vmem>>) attributes {dimension_semantics = [#tpu.dimension_semantics<parallel>, #tpu.dimension_semantics<parallel>], iteration_bounds = array<i64: 1, 1>, scalar_prefetch = 0 : i64, scratch_operands = 0 : i64, tpu.core_type = #tpu.core_type<tc>, window_params = [{transform_indices = @transform_0, window_bounds = array<i64: 16, 32>}, {transform_indices = @transform_1, window_bounds = array<i64: 32, 64>}, {transform_indices = @transform_2, window_bounds = array<i64: 1, 64>}, {transform_indices = @transform_3, window_bounds = array<i64: 16, 64>}]} {
    %c0 = arith.constant 0 : index
    %c0_0 = arith.constant 0 : index
    %0 = vector.load %arg2[%c0, %c0_0] : memref<16x32xf32, #tpu.memory_space<vmem>>, vector<16x32xf32>
    %c0_1 = arith.constant 0 : index
    %c0_2 = arith.constant 0 : index
    %1 = vector.load %arg3[%c0_1, %c0_2] : memref<32x64xf32, #tpu.memory_space<vmem>>, vector<32x64xf32>
    %cst = arith.constant dense<0.000000e+00> : vector<16x64xf32>
    %2 = tpu.matmul %0, %1, %cst {dimension_numbers = #tpu.dot_dimension_numbers<[1], [0], [0], [1], [0, 0, 1, 1], [], []>, precision = #tpu.contract_precision<fp32>} : vector<16x32xf32>, vector<32x64xf32>, vector<16x64xf32> -> vector<16x64xf32>
    %c0_3 = arith.constant 0 : index
    %c0_4 = arith.constant 0 : index
    %3 = vector.load %arg4[%c0_3, %c0_4] : memref<1x64xf32, #tpu.memory_space<vmem>>, vector<1x64xf32>
    %4 = vector.broadcast %3 : vector<1x64xf32> to vector<16x64xf32>
    %5 = arith.addf %2, %4 : vector<16x64xf32>
    %c0_5 = arith.constant 0 : index
    %c0_6 = arith.constant 0 : index
    %6 = vector.load %arg5[%c0_5, %c0_6] : memref<16x64xf32, #tpu.memory_space<vmem>>, vector<16x64xf32>
    tpu.vector_store %arg5[%c0_5, %c0_6], %5 {strides = array<i32>} : memref<16x64xf32, #tpu.memory_space<vmem>>, vector<16x64xf32>,
    return
  }
  func.func @transform_0(%arg0: i32, %arg1: i32) -> (i32, i32) {
    %c0_i32 = arith.constant 0 : i32
    %c0_i32_0 = arith.constant 0 : i32
    return %arg0, %c0_i32 : i32, i32
  }
  func.func @transform_1(%arg0: i32, %arg1: i32) -> (i32, i32) {
    %c0_i32 = arith.constant 0 : i32
    %c0_i32_0 = arith.constant 0 : i32
    return %c0_i32, %arg1 : i32, i32
  }
  func.func @transform_2(%arg0: i32, %arg1: i32) -> (i32, i32) {
    %c0_i32 = arith.constant 0 : i32
    %c0_i32_0 = arith.constant 0 : i32
    return %c0_i32, %arg1 : i32, i32
  }
  func.func @transform_3(%arg0: i32, %arg1: i32) -> (i32, i32) {
    %c0_i32 = arith.constant 0 : i32
    return %arg0, %arg1 : i32, i32
  }
}

</mosaic_0001>

<bundles_post_ra>
// kernel: tpu_custom_call.1
= control target key start
LH: loop header
LB: loop body
LE: loop exit
PB: predicated region body
PF: predicated region fallthrough
CT: control target
= control target key end

     0   :  { %8 = vsyncpa [#allocation3], 0  ;;  %s937_s0 = inlined_call_operand.hbm [shape: f32[16,32], index: 0, kind: input, shape index: {}]   ;;  %s938_s1 = inlined_call_operand.hbm [shape: f32[32,64], index: 1, kind: input, shape index: {}]   ;;  %s939_s2 = inlined_call_operand.vmem [shape: f32[1,64], index: 2, kind: input, shape index: {}]   ;;  %s940_s3 = inlined_call_operand.hbm [shape: f32[16,64], index: 3, kind: output, shape index: {}]  }
   0x1   :  { %9 = vsyncpa [#allocation6], 0 }
   0x2   :  { %10 = vsyncpa [#allocation4], 0  ;;  %s852_s12 = smov [#allocation2]   ;;  %s780_s16 = scalar_lea.hbm %s937_s0, 256 }
   0x3   :  { %s16_s13 = sshll.u32 %s852_s12, 4  ;;  %p781_p0 = scmp.ne.s32.totalorder %s937_s0, %s780_s16  ;;  %s17_s13 = int_to_ptr.vmem [resolvable:$true] %s16_s13 }
   0x4   :  { %p784_p1 = scmp.lt.u32.totalorder %s780_s16, %s937_s0 }
   0x6   :  { %p786_p2 = pnand %p784_p1, %p781_p0 }
   0x8   :  { %789 = shalt.err (!%p786_p2)
}
   0x9   :  { %s790_s21 = scalar_lea.vmem %s17_s13, 256  ;;  %p795_p4 = scmp.lt.s32.totalorder %s17_s13, %s17_s13 }
   0xa   :  { %p791_p3 = scmp.ne.s32.totalorder %s17_s13, %s790_s21  ;;  %p796_p5 = scmp.lt.s32.totalorder %s790_s21, %s790_s21 }
   0xc   :  { %p797_p6 = por %p796_p5, %p795_p4 }
   0xe   :  { %p798_p7 = pnand %p797_p6, %p791_p3 }
  0x10   :  { %801 = shalt.err (!%p798_p7)
}
  0x11   :  { %s853_s22 = smov 128   ;;  %s854_s23 = smov 8  }
  0x12   :  { %22 = dma.hbm_to_vmem [thread:$0]  %s937_s0, 256, %s17_s13, [#allocation3], %s853_s22, %s853_s22, %s854_s23  }
  0x13   :  { %s855_s26 = smov [#allocation5]   ;;  %s802_s30 = scalar_lea.hbm %s938_s1, 512 }
  0x14   :  { %s28_s27 = sshll.u32 %s855_s26, 4  ;;  %p803_p8 = scmp.ne.s32.totalorder %s938_s1, %s802_s30  ;;  %s29_s27 = int_to_ptr.vmem [resolvable:$true] %s28_s27 }
  0x15   :  { %p806_p9 = scmp.lt.u32.totalorder %s802_s30, %s938_s1 }
  0x17   :  { %p808_p10 = pnand %p806_p9, %p803_p8 }
  0x19   :  { %811 = shalt.err (!%p808_p10)
}
  0x1a   :  { %s812_s8 = scalar_lea.vmem %s29_s27, 512  ;;  %p817_p12 = scmp.lt.s32.totalorder %s29_s27, %s29_s27 }
  0x1b   :  { %p813_p11 = scmp.ne.s32.totalorder %s29_s27, %s812_s8  ;;  %p818_p13 = scmp.lt.s32.totalorder %s812_s8, %s812_s8 }
  0x1d   :  { %p819_p0 = por %p818_p13, %p817_p12 }
  0x1f   :  { %p820_p1 = pnand %p819_p0, %p813_p11 }
  0x21   :  { %823 = shalt.err (!%p820_p1)
}
  0x22   :  { %34 = dma.hbm_to_vmem [thread:$0]  %s938_s1, 512, %s29_s27, [#allocation6], %s853_s22, %s853_s22, %s854_s23  }
  0x23   :  { %846 = dma.done.wait [#allocation3], 256  }
  0x24   :  { %847 = vsyncadd [#allocation3], 4294967040 }
  0x25   :  { %848 = dma.done.wait [#allocation6], 512  }
  0x26   :  { %849 = vsyncadd [#allocation6], 4294966784  ;;  %vm56_vm0 = vcmask 261120   ;;  %v45_v0 = vld [vmem:[#allocation5] sm:$0xff]  ;;  %v46_v1 = vld [vmem:[#allocation5 + $0x8] sm:$0xff]  ;;  %s856_s11 = smov [#allocation7]  }
  0x27   :  { %v47_v2 = vld [vmem:[#allocation5 + $0x10] sm:$0xff]  ;;  %v64_v3 = vand.u32 4294901760, %v45_v0  ;;  %v67_v4 = vand.u32 4294901760, %v46_v1  ;;  %v48_v5 = vld [vmem:[#allocation5 + $0x18] sm:$0xff]  ;;  %s599_s12 = sshll.u32 %s856_s11, 4  ;;  %vm591_vm1 = vcmask 523264   ;;  %s600_s12 = int_to_ptr.vmem [resolvable:$true] %s599_s12 }
  0x28   :  { %v70_v6 = vand.u32 4294901760, %v47_v2  ;;  %v43_v7 = vld [vmem:[#allocation2] sm:$0xff]  ;;  %v44_v8 = vld [vmem:[#allocation2 + $0x8] sm:$0xff]  ;;  %v73_v9 = vand.u32 4294901760, %v48_v5  ;;  %s824_s13 = scalar_lea.vmem %s600_s12, 256  ;;  %p829_p3 = scmp.lt.s32.totalorder %s600_s12, %s600_s12 }
  0x29   :  { %v58_v10 = vsel %vm56_vm0, %v43_v7, 0  ;;  %v61_v11 = vsel %vm56_vm0, %v44_v8, 0  ;;  %v715_v12 = vpack.c.bf16 %v67_v4, %v64_v3  ;;  %v154_v15 = vsub.f32 %v45_v0, %v64_v3  ;;  %v612_v46 = vld [vmem:[%s939_s2] ss:$0 sm:$0xff]  ;;  %p825_p2 = scmp.ne.s32.totalorder %s600_s12, %s824_s13  ;;  %p830_p4 = scmp.lt.s32.totalorder %s824_s13, %s824_s13 }
  0x2a   :  { %v907_v13 = vand.u32 4294901760, %v58_v10  ;;  %v909_v14 = vand.u32 4294901760, %v61_v11  ;;  %v719_v16 = vpack.c.bf16 %v73_v9, %v70_v6  ;;  %v161_v17 = vsub.f32 %v46_v1, %v67_v4 }
  0x2b   :  { %v168_v18 = vsub.f32 %v47_v2, %v70_v6  ;;  %v175_v19 = vsub.f32 %v48_v5, %v73_v9  ;;  %716 = vmatprep.subr.bf16.mxu1 %v715_v12  ;;  %740 = vmatprep.subr.bf16.mxu0 %v715_v12  ;;  %v155_v22 = vand.u32 4294901760, %v154_v15  ;;  %p831_p5 = por %p830_p4, %p829_p3 }
  0x2c   :  { %v133_v20 = vsub.f32 %v58_v10, %v907_v13  ;;  %v143_v21 = vsub.f32 %v61_v11, %v909_v14  ;;  %718 = vmatpush3.bf16.msra.mxu1 %v715_v12  ;;  %742 = vmatpush3.bf16.msra.mxu0 %v715_v12  ;;  %v162_v23 = vand.u32 4294901760, %v161_v17  ;;  %v731_v44 = vpack.c.bf16 %v161_v17, %v154_v15 }
  0x2d   :  { %v169_v24 = vand.u32 4294901760, %v168_v18  ;;  %v176_v25 = vand.u32 4294901760, %v175_v19  ;;  %720 = vmatprep.subr.bf16.mxu1 %v719_v16  ;;  %744 = vmatprep.subr.bf16.mxu0 %v719_v16  ;;  %v156_v28 = vsub.f32 %v154_v15, %v155_v22  ;;  %v735_v45 = vpack.c.bf16 %v175_v19, %v168_v18  ;;  %p832_p6 = pnand %p831_p5, %p825_p2 }
  0x2e   :  { %v134_v26 = vand.u32 4294901760, %v133_v20  ;;  %v144_v27 = vand.u32 4294901760, %v143_v21  ;;  %v163_v29 = vsub.f32 %v161_v17, %v162_v23  ;;  %v747_v30 = vpack.c.bf16 %v162_v23, %v155_v22 }
  0x2f   :  { %v170_v31 = vsub.f32 %v168_v18, %v169_v24  ;;  %v177_v32 = vsub.f32 %v175_v19, %v176_v25  ;;  %v157_v35 = vand.u32 4294901760, %v156_v28  ;;  %v751_v43 = vpack.c.bf16 %v176_v25, %v169_v24 }
  0x30   :  { %v135_v33 = vsub.f32 %v133_v20, %v134_v26  ;;  %690 = vmatprep.mubr.f32.mxu0 %v134_v26  ;;  %v145_v34 = vsub.f32 %v143_v21, %v144_v27  ;;  %722 = vmatpush3.bf16.msra.mxu1 %v719_v16  ;;  %v164_v36 = vand.u32 4294901760, %v163_v29 }
  0x31   :  { %746 = vmatpush3.bf16.msra.mxu0 %v719_v16  ;;  %v171_v37 = vand.u32 4294901760, %v170_v31  ;;  %v178_v38 = vand.u32 4294901760, %v177_v32 }
  0x32   :  { %v136_v39 = vand.u32 4294901760, %v135_v33  ;;  %v146_v40 = vand.u32 4294901760, %v145_v34  ;;  %748 = vmatprep.subr.bf16.mxu0 %v747_v30  ;;  %v723_v41 = vpack.c.bf16 %v164_v36, %v157_v35 }
  0x33   :  { %v727_v42 = vpack.c.bf16 %v178_v38, %v171_v37 }
  0x34   :  { %657 = vmatprep.mubr.f32.mxu1 %v136_v39  ;;  %691 = vmatmul.mubr.f32.vlgmr.msra.gmra.mrb[0].mxu0 %v144_v27 }
  0x35   :  { %658 = vmatmul.mubr.f32.vlgmr.msra.gmra.mrb[0].mxu1 %v146_v40  ;;  %724 = vmatprep.subr.bf16.mxu1 %v723_v41 }
  0x36   :  { %726 = vmatpush3.bf16.msra.mxu1 %v723_v41  ;;  %750 = vmatpush3.bf16.msra.mxu0 %v747_v30 }
  0x37   :  { %728 = vmatprep.subr.bf16.mxu1 %v727_v42  ;;  %752 = vmatprep.subr.bf16.mxu0 %v751_v43 }
  0x38   :  { %668 = vmatprep.mubr.f32.mxu1 %v907_v13  ;;  %701 = vmatprep.mubr.f32.mxu0 %v907_v13 }
  0x3a   :  { %730 = vmatpush3.bf16.msra.mxu1 %v727_v42  ;;  %754 = vmatpush3.bf16.msra.mxu0 %v751_v43 }
  0x3b   :  { %732 = vmatprep.subr.bf16.mxu1 %v731_v44  ;;  %756 = vmatprep.subr.bf16.mxu0 %v715_v12 }
  0x3d   :  { %669 = vmatmul.mubr.f32.vlgmr.msra.gmra.mrb[0].mxu1 %v909_v14  ;;  %702 = vmatmul.mubr.f32.vlgmr.msra.gmra.mrb[0].mxu0 %v909_v14 }
  0x3e   :  { %734 = vmatpush3.bf16.msra.mxu1 %v731_v44  ;;  %758 = vmatpush3.bf16.msra.mxu0 %v715_v12 }
  0x3f   :  { %736 = vmatprep.subr.bf16.mxu1 %v735_v45  ;;  %760 = vmatprep.subr.bf16.mxu0 %v719_v16 }
  0x40   :  { %679 = vmatprep.mubr.f32.mxu1 %v133_v20  ;;  %712 = vmatprep.mubr.f32.mxu0 %v907_v13 }
  0x42   :  { %738 = vmatpush3.bf16.msra.mxu1 %v735_v45  ;;  %762 = vmatpush3.bf16.msra.mxu0 %v719_v16 }
  0x45   :  { %680 = vmatmul.mubr.f32.vlgmr.msra.gmra.mrb[0].mxu1 %v143_v21  ;;  %713 = vmatmul.mubr.f32.vlgmr.msra.gmra.mrb[0].mxu0 %v909_v14 }
 0x118   :  { %v681_v47 = vpop.f32.mrb[0].mxu1  ;;  %v714_v48 = vpop.f32.mrb[0].mxu0 }
 0x119   :  { %v763_v49 = vadd.f32 %v681_v47, %v612_v46  ;;  %v325_v50 = vpop.f32.mrb[1].mxu1  ;;  %v581_v51 = vpop.f32.mrb[1].mxu0 }
 0x11a   :  { %v765_v52 = vadd.f32 %v612_v46, %v325_v50 }
 0x11b   :  { %v764_v53 = vadd.f32 %v763_v49, %v714_v48 }
 0x11c   :  { %v766_v54 = vadd.f32 %v765_v52, %v581_v51 }
 0x11d   :  { %593 = vst.msk [vmem:[#allocation7 + $0x8] sm:$0xff] %vm591_vm1, %v764_v53 }
 0x11e   :  { %592 = vst.msk [vmem:[#allocation7] sm:$0xff] %vm591_vm1, %v766_v54 }
 0x11f   :  { %835 = shalt.err (!%p832_p6)
}
 0x120   :  { %s836_s15 = scalar_lea.hbm %s940_s3, 256 }
 0x121   :  { %p837_p7 = scmp.ne.s32.totalorder %s940_s3, %s836_s15  ;;  %p840_p8 = scmp.lt.u32.totalorder %s836_s15, %s940_s3 }
 0x123   :  { %p842_p9 = pnand %p840_p8, %p837_p7 }
 0x125   :  { %845 = shalt.err (!%p842_p9)
}
 0x126   :  { %605 = dma.vmem_to_hbm [thread:$0]  %s600_s12, 256, %s940_s3, [#allocation4], %s853_s22, %s853_s22, %s854_s23  }
 0x127   :  { %850 = dma.done.wait [#allocation4], 256  }
 0x128   :  { %851 = vsyncadd [#allocation4], 4294967040 }
 0x129   :  { %609 = vsyncpa [#allocation3], 1 }
 0x12a   :  { %610 = vsyncpa [#allocation6], 1 }
 0x12b   :  { %611 = vsyncpa [#allocation4], 1 }

</bundles_post_ra>
